<compile_context>
chip_gen: v6e
topology: v6e:2x2x1
jax: 0.10.0
libtpu: 0.0.40
codegen_flags: <defaults>
</compile_context>

<pallas_src>
import functools

import jax
import jax.numpy as jnp
from jax.experimental import pallas as pl
from jax.experimental.pallas import tpu as pltpu

LANE = 128
SUBLANE = 8


def _round_up(n, m):
    return ((n + m - 1) // m) * m


def _pad_axis(x, axis, target):
    pad = target - x.shape[axis]
    if pad <= 0:
        return x
    widths = [(0, 0)] * x.ndim
    widths[axis] = (0, pad)
    return jnp.pad(x, widths)


# ------------------------------- fused kernel ------------------------------ #

def _fused_model_kernel(cols_ref, off_ref, cw_ref, cb_ref,
                        w1_ref, b1_ref, w2_ref, b2_ref, o_ref, *, inv_hw):
    """Per-batch fully fused forward pass.

    cols_ref : (H*W, 9*Cin) bf16   im2col of the zero-padded image (this batch)
    off_ref  : (1, DPAD)    f32    flattened node offsets (lane-padded, this batch)
    cw_ref   : (9*Cin, CPAD) bf16  conv weights, tap order (kh, kw, c)
    cb_ref   : (1, CPAD)    f32    conv bias (zero lane-padding)
    w1_ref   : (CPAD, HPAD) bf16   b1_ref : (1, HPAD) f32
    w2_ref   : (HPAD, DPAD) bf16   b2_ref : (1, DPAD) f32
    o_ref    : (8, DPAD)    f32    node predictions (rows replicated; row 0 used)
    """
    # ---- backbone: 3x3 conv as ONE MXU pass (M = H*W, K = 9*Cin) ----
    conv = jnp.dot(cols_ref[...], cw_ref[...],
                   preferred_element_type=jnp.float32)          # (HW, CPAD) f32
    feat = jnp.maximum(conv + cb_ref[...], 0.0)                 # f32 bias + ReLU
    # Padded CPAD lanes are exactly 0 here (zero conv_w/conv_b pad, ReLU(0)=0),
    # so the global mean pool over them stays 0 and cannot leak into the head.
    pooled = jnp.sum(feat, axis=0, keepdims=True) * inv_hw      # (1, CPAD) f32

    # ---- cloth head: pooled -> ReLU(hidden) -> node coords (+ offset) ----
    # In-kernel sublane broadcast only (no wrapper replication / extra HBM);
    # the MXU consumes an 8-row tile regardless, so this costs nothing.
    x = jnp.broadcast_to(pooled, (SUBLANE, pooled.shape[1])).astype(jnp.bfloat16)
    h = jnp.dot(x, w1_ref[...], preferred_element_type=jnp.float32)
    h = jnp.maximum(h + b1_ref[...], 0.0)                       # f32 epilogue
    out = jnp.dot(h.astype(jnp.bfloat16), w2_ref[...],
                  preferred_element_type=jnp.float32)
    o_ref[...] = out + b2_ref[...] + off_ref[...]               # unmasked (8,128) store


# ------------------------------ JAX wrapper --------------------------------- #

def main_model_forward(batch, is_training, read_intermediate, offset, params):
    """Mirrors MainModel.forward(batch, is_training, read_intermediate, offset)."""
    # is_training: no dropout/BN in this synthetic backbone/head -> no-op.
    # TODO(synk): read_intermediate would also return hidden activations in the
    # original cloth model; unspecified here, so it is ignored.
    del is_training, read_intermediate

    conv_w, conv_b = params["conv_w"], params["conv_b"]
    w1, b1, w2, b2 = params["w1"], params["b1"], params["w2"], params["b2"]

    # ---- backbone input prep (tiny XLA glue) ----
    # Cast to bf16 BEFORE padding/im2col so no f32 intermediate is materialized.
    x = jnp.transpose(batch, (0, 2, 3, 1)).astype(jnp.bfloat16)   # NCHW -> NHWC
    B, H, W, Cin = x.shape
    xp = jnp.pad(x, ((0, 0), (1, 1), (1, 1), (0, 0)))             # 'same' zero pad
    # im2col: (B, H*W, 9*Cin); tap order (kh, kw, c) matches conv_w.reshape below.
    cols = jnp.concatenate(
        [xp[:, kh:kh + H, kw:kw + W, :] for kh in range(3) for kw in range(3)],
        axis=-1).reshape(B, H * W, 9 * Cin)

    Cfeat = conv_w.shape[-1]
    Hid = w1.shape[1]
    Dout = w2.shape[1]
    CPAD = _round_up(Cfeat, LANE)
    HPAD = _round_up(Hid, LANE)
    DPAD = _round_up(Dout, LANE)

    # Lane-padded, VMEM-resident parameters.  All pads are zeros (see kernel
    # comment: padded lanes must stay exactly zero through ReLU/pool).
    cw = _pad_axis(conv_w.reshape(9 * Cin, Cfeat), 1, CPAD).astype(jnp.bfloat16)
    cb = _pad_axis(conv_b, 0, CPAD).reshape(1, CPAD).astype(jnp.float32)
    w1p = _pad_axis(_pad_axis(w1, 0, CPAD), 1, HPAD).astype(jnp.bfloat16)
    b1p = _pad_axis(b1, 0, HPAD).reshape(1, HPAD).astype(jnp.float32)
    w2p = _pad_axis(_pad_axis(w2, 0, HPAD), 1, DPAD).astype(jnp.bfloat16)
    b2p = _pad_axis(b2, 0, DPAD).reshape(1, DPAD).astype(jnp.float32)

    # One (1, DPAD) offset row per batch element -- no broadcast-to-8 glue.
    off = _pad_axis(offset.reshape(B, Dout), 1, DPAD)
    off = off.reshape(B, 1, DPAD).astype(jnp.float32)

    out = pl.pallas_call(
        functools.partial(_fused_model_kernel, inv_hw=1.0 / float(H * W)),
        out_shape=jax.ShapeDtypeStruct((B, SUBLANE, DPAD), jnp.float32),
        grid=(B,),
        in_specs=[
            pl.BlockSpec((None, H * W, 9 * Cin), lambda b: (b, 0, 0)),   # im2col
            pl.BlockSpec((None, 1, DPAD), lambda b: (b, 0, 0)),          # offsets
            pl.BlockSpec((9 * Cin, CPAD), lambda b: (0, 0)),             # resident
            pl.BlockSpec((1, CPAD), lambda b: (0, 0)),                   # resident
            pl.BlockSpec((CPAD, HPAD), lambda b: (0, 0)),                # resident
            pl.BlockSpec((1, HPAD), lambda b: (0, 0)),                   # resident
            pl.BlockSpec((HPAD, DPAD), lambda b: (0, 0)),                # resident
            pl.BlockSpec((1, DPAD), lambda b: (0, 0)),                   # resident
        ],
        out_specs=pl.BlockSpec((None, SUBLANE, DPAD), lambda b: (b, 0, 0)),
        compiler_params=pltpu.CompilerParams(
            dimension_semantics=("parallel",),          # batch -> v7x megacore
            vmem_limit_bytes=32 * 1024 * 1024),         # explicit for v7x 64 MiB
    )(cols, off, cw, cb, w1p, b1p, w2p, b2p)

    node_pred = out[:, 0, :Dout]                        # drop replicas / lane pad
    return node_pred.reshape(B, Dout // 3, 3)           # (B, N_nodes, 3)


# Pure-JAX reference (loose numerical sanity check; kernel uses bf16 MXU operands).
def _reference_forward(x_nchw, offset, params):
    x = jnp.transpose(x_nchw, (0, 2, 3, 1))
    conv = jax.lax.conv_general_dilated(
        x, params["conv_w"], window_strides=(1, 1), padding="SAME",
        dimension_numbers=("NHWC", "HWIO", "NHWC"))
    feat = jnp.maximum(conv + params["conv_b"], 0.0)
    pooled = feat.mean(axis=(1, 2))
    h = jnp.maximum(pooled @ params["w1"] + params["b1"], 0.0)
    out = h @ params["w2"] + params["b2"]
    return out.reshape(x.shape[0], -1, 3) + offset


# --------------------------------- main ------------------------------------ #

if __name__ == "__main__":
    # Small, deterministic shapes.
    B, Cin, H, W = 2, 4, 16, 16
    Cfeat, Hid, N_nodes = 32, 64, 8
    Dout = N_nodes * 3

    key = jax.random.PRNGKey(0)
    k_x, k_off, k_cw, k_w1, k_w2 = jax.random.split(key, 5)

    x_nchw = jax.random.normal(k_x, (B, Cin, H, W), jnp.float32)       # NCHW input
    offset = 0.01 * jax.random.normal(k_off, (B, N_nodes, 3), jnp.float32)

    params = {
        "conv_w": 0.1 * jax.random.normal(k_cw, (3, 3, Cin, Cfeat), jnp.float32),
        "conv_b": jnp.zeros((Cfeat,), jnp.float32),
        "w1": 0.1 * jax.random.normal(k_w1, (Cfeat, Hid), jnp.float32),
        "b1": jnp.zeros((Hid,), jnp.float32),
        "w2": 0.1 * jax.random.normal(k_w2, (Hid, Dout), jnp.float32),
        "b2": jnp.zeros((Dout,), jnp.float32),
    }

    forward = jax.jit(main_model_forward, static_argnums=(1, 2))
    node_pred = forward(x_nchw, False, False, offset, params)
    node_pred = jax.block_until_ready(node_pred)

    assert node_pred.shape == (B, N_nodes, 3)
    assert bool(jnp.all(jnp.isfinite(node_pred)))

    ref = _reference_forward(x_nchw, offset, params)
    assert bool(jnp.allclose(node_pred, ref, rtol=2e-2, atol=2e-2)), (
        float(jnp.max(jnp.abs(node_pred - ref))))

    print("KERNEL_OK")
</pallas_src>

<mosaic_0001>
module attributes {stable_mosaic.version = 11 : i64} {
  func.func @_fused_model_kernel(%arg0: i32, %arg1: memref<1x256x36xbf16, #tpu.memory_space<vmem>>, %arg2: memref<1x1x128xf32, #tpu.memory_space<vmem>>, %arg3: memref<36x128xbf16, #tpu.memory_space<vmem>>, %arg4: memref<1x128xf32, #tpu.memory_space<vmem>>, %arg5: memref<128x128xbf16, #tpu.memory_space<vmem>>, %arg6: memref<1x128xf32, #tpu.memory_space<vmem>>, %arg7: memref<128x128xbf16, #tpu.memory_space<vmem>>, %arg8: memref<1x128xf32, #tpu.memory_space<vmem>>, %arg9: memref<1x8x128xf32, #tpu.memory_space<vmem>>) attributes {dimension_semantics = [#tpu.dimension_semantics<parallel>], iteration_bounds = array<i64: 2>, scalar_prefetch = 0 : i64, scratch_operands = 0 : i64, tpu.core_type = #tpu.core_type<tc>, window_params = [{transform_indices = @transform_0, window_bounds = array<i64: 1, 256, 36>}, {transform_indices = @transform_1, window_bounds = array<i64: 1, 1, 128>}, {pipeline_mode = #tpu.pipeline_mode<synchronous>, transform_indices = @transform_2, window_bounds = array<i64: 36, 128>}, {pipeline_mode = #tpu.pipeline_mode<synchronous>, transform_indices = @transform_3, window_bounds = array<i64: 1, 128>}, {pipeline_mode = #tpu.pipeline_mode<synchronous>, transform_indices = @transform_4, window_bounds = array<i64: 128, 128>}, {pipeline_mode = #tpu.pipeline_mode<synchronous>, transform_indices = @transform_5, window_bounds = array<i64: 1, 128>}, {pipeline_mode = #tpu.pipeline_mode<synchronous>, transform_indices = @transform_6, window_bounds = array<i64: 128, 128>}, {pipeline_mode = #tpu.pipeline_mode<synchronous>, transform_indices = @transform_7, window_bounds = array<i64: 1, 128>}, {transform_indices = @transform_8, window_bounds = array<i64: 1, 8, 128>}]} {
    %c0 = arith.constant 0 : index
    %c0_0 = arith.constant 0 : index
    %c0_1 = arith.constant 0 : index
    %0 = vector.load %arg1[%c0, %c0_0, %c0_1] : memref<1x256x36xbf16, #tpu.memory_space<vmem>>, vector<1x256x36xbf16>
    %1 = vector.shape_cast %0 : vector<1x256x36xbf16> to vector<256x36xbf16>
    %c0_2 = arith.constant 0 : index
    %c0_3 = arith.constant 0 : index
    %2 = vector.load %arg3[%c0_2, %c0_3] : memref<36x128xbf16, #tpu.memory_space<vmem>>, vector<36x128xbf16>
    %cst = arith.constant dense<0.000000e+00> : vector<256x128xf32>
    %3 = tpu.matmul %1, %2, %cst {dimension_numbers = #tpu.dot_dimension_numbers<[1], [0], [0], [1], [0, 0, 1, 1], [], []>} : vector<256x36xbf16>, vector<36x128xbf16>, vector<256x128xf32> -> vector<256x128xf32>
    %c0_4 = arith.constant 0 : index
    %c0_5 = arith.constant 0 : index
    %4 = vector.load %arg4[%c0_4, %c0_5] : memref<1x128xf32, #tpu.memory_space<vmem>>, vector<1x128xf32>
    %5 = vector.broadcast %4 : vector<1x128xf32> to vector<256x128xf32>
    %6 = arith.addf %3, %5 : vector<256x128xf32>
    %cst_6 = arith.constant 0.000000e+00 : f32
    %7 = vector.broadcast %cst_6 : f32 to vector<256x128xf32>
    %8 = arith.maximumf %6, %7 : vector<256x128xf32>
    %cst_7 = arith.constant dense<0.000000e+00> : vector<128xf32>
    %9 = vector.multi_reduction <add>, %8, %cst_7 [0] : vector<256x128xf32> to vector<128xf32>
    %10 = vector.shape_cast %9 : vector<128xf32> to vector<1x128xf32>
    %cst_8 = arith.constant 3.906250e-03 : f32
    %11 = vector.broadcast %cst_8 : f32 to vector<1x128xf32>
    %12 = arith.mulf %10, %11 : vector<1x128xf32>
    %13 = vector.shape_cast %12 : vector<1x128xf32> to vector<1x128xf32>
    %14 = vector.broadcast %13 : vector<1x128xf32> to vector<8x128xf32>
    %15 = arith.truncf %14 : vector<8x128xf32> to vector<8x128xbf16>
    %c0_9 = arith.constant 0 : index
    %c0_10 = arith.constant 0 : index
    %16 = vector.load %arg5[%c0_9, %c0_10] : memref<128x128xbf16, #tpu.memory_space<vmem>>, vector<128x128xbf16>
    %cst_11 = arith.constant dense<0.000000e+00> : vector<8x128xf32>
    %17 = tpu.matmul %15, %16, %cst_11 {dimension_numbers = #tpu.dot_dimension_numbers<[1], [0], [0], [1], [0, 0, 1, 1], [], []>} : vector<8x128xbf16>, vector<128x128xbf16>, vector<8x128xf32> -> vector<8x128xf32>
    %c0_12 = arith.constant 0 : index
    %c0_13 = arith.constant 0 : index
    %18 = vector.load %arg6[%c0_12, %c0_13] : memref<1x128xf32, #tpu.memory_space<vmem>>, vector<1x128xf32>
    %19 = vector.broadcast %18 : vector<1x128xf32> to vector<8x128xf32>
    %20 = arith.addf %17, %19 : vector<8x128xf32>
    %cst_14 = arith.constant 0.000000e+00 : f32
    %21 = vector.broadcast %cst_14 : f32 to vector<8x128xf32>
    %22 = arith.maximumf %20, %21 : vector<8x128xf32>
    %23 = arith.truncf %22 : vector<8x128xf32> to vector<8x128xbf16>
    %c0_15 = arith.constant 0 : index
    %c0_16 = arith.constant 0 : index
    %24 = vector.load %arg7[%c0_15, %c0_16] : memref<128x128xbf16, #tpu.memory_space<vmem>>, vector<128x128xbf16>
    %cst_17 = arith.constant dense<0.000000e+00> : vector<8x128xf32>
    %25 = tpu.matmul %23, %24, %cst_17 {dimension_numbers = #tpu.dot_dimension_numbers<[1], [0], [0], [1], [0, 0, 1, 1], [], []>} : vector<8x128xbf16>, vector<128x128xbf16>, vector<8x128xf32> -> vector<8x128xf32>
    %c0_18 = arith.constant 0 : index
    %c0_19 = arith.constant 0 : index
    %26 = vector.load %arg8[%c0_18, %c0_19] : memref<1x128xf32, #tpu.memory_space<vmem>>, vector<1x128xf32>
    %27 = vector.broadcast %26 : vector<1x128xf32> to vector<8x128xf32>
    %28 = arith.addf %25, %27 : vector<8x128xf32>
    %c0_20 = arith.constant 0 : index
    %c0_21 = arith.constant 0 : index
    %c0_22 = arith.constant 0 : index
    %29 = vector.load %arg2[%c0_20, %c0_21, %c0_22] : memref<1x1x128xf32, #tpu.memory_space<vmem>>, vector<1x1x128xf32>
    %30 = vector.shape_cast %29 : vector<1x1x128xf32> to vector<1x128xf32>
    %31 = vector.broadcast %30 : vector<1x128xf32> to vector<8x128xf32>
    %32 = arith.addf %28, %31 : vector<8x128xf32>
    %c0_23 = arith.constant 0 : index
    %c0_24 = arith.constant 0 : index
    %c0_25 = arith.constant 0 : index
    %33 = vector.load %arg9[%c0_23, %c0_24, %c0_25] : memref<1x8x128xf32, #tpu.memory_space<vmem>>, vector<1x8x128xf32>
    %34 = vector.shape_cast %33 : vector<1x8x128xf32> to vector<8x128xf32>
    %35 = vector.shape_cast %32 : vector<8x128xf32> to vector<1x8x128xf32>
    tpu.vector_store %arg9[%c0_23, %c0_24, %c0_25], %35 {strides = array<i32>} : memref<1x8x128xf32, #tpu.memory_space<vmem>>, vector<1x8x128xf32>,
    return
  }
  func.func @transform_0(%arg0: i32) -> (i32, i32, i32) {
    %c0_i32 = arith.constant 0 : i32
    %c0_i32_0 = arith.constant 0 : i32
    %c0_i32_1 = arith.constant 0 : i32
    return %arg0, %c0_i32, %c0_i32_0 : i32, i32, i32
  }
  func.func @transform_1(%arg0: i32) -> (i32, i32, i32) {
    %c0_i32 = arith.constant 0 : i32
    %c0_i32_0 = arith.constant 0 : i32
    %c0_i32_1 = arith.constant 0 : i32
    return %arg0, %c0_i32, %c0_i32_0 : i32, i32, i32
  }
  func.func @transform_2(%arg0: i32) -> (i32, i32) {
    %c0_i32 = arith.constant 0 : i32
    %c0_i32_0 = arith.constant 0 : i32
    %c0_i32_1 = arith.constant 0 : i32
    return %c0_i32, %c0_i32_0 : i32, i32
  }
  func.func @transform_3(%arg0: i32) -> (i32, i32) {
    %c0_i32 = arith.constant 0 : i32
    %c0_i32_0 = arith.constant 0 : i32
    %c0_i32_1 = arith.constant 0 : i32
    return %c0_i32, %c0_i32_0 : i32, i32
  }
  func.func @transform_4(%arg0: i32) -> (i32, i32) {
    %c0_i32 = arith.constant 0 : i32
    %c0_i32_0 = arith.constant 0 : i32
    %c0_i32_1 = arith.constant 0 : i32
    return %c0_i32, %c0_i32_0 : i32, i32
  }
  func.func @transform_5(%arg0: i32) -> (i32, i32) {
    %c0_i32 = arith.constant 0 : i32
    %c0_i32_0 = arith.constant 0 : i32
    %c0_i32_1 = arith.constant 0 : i32
    return %c0_i32, %c0_i32_0 : i32, i32
  }
  func.func @transform_6(%arg0: i32) -> (i32, i32) {
    %c0_i32 = arith.constant 0 : i32
    %c0_i32_0 = arith.constant 0 : i32
    %c0_i32_1 = arith.constant 0 : i32
    return %c0_i32, %c0_i32_0 : i32, i32
  }
  func.func @transform_7(%arg0: i32) -> (i32, i32) {
    %c0_i32 = arith.constant 0 : i32
    %c0_i32_0 = arith.constant 0 : i32
    %c0_i32_1 = arith.constant 0 : i32
    return %c0_i32, %c0_i32_0 : i32, i32
  }
  func.func @transform_8(%arg0: i32) -> (i32, i32, i32) {
    %c0_i32 = arith.constant 0 : i32
    %c0_i32_0 = arith.constant 0 : i32
    %c0_i32_1 = arith.constant 0 : i32
    return %arg0, %c0_i32, %c0_i32_0 : i32, i32, i32
  }
}

</mosaic_0001>

<bundles_post_ra>
// kernel: squeeze.1
= control target key start
LH: loop header
LB: loop body
LE: loop exit
PB: predicated region body
PF: predicated region fallthrough
CT: control target
= control target key end

     0   :  { %s67_s8 = smov 119   ;;  %vm8_vm0 = vcmask 23552   ;;  %s68_s11 = smov 122   ;;  %s118_s0 = inlined_call_operand.vmem [shape: f32[2,24], index: 0, kind: input, shape index: {}]   ;;  %s119_s1 = inlined_call_operand.vmem [shape: f32[2,8,3], index: 1, kind: output, shape index: {}]  }
   0x1   :  { %v5_v0 = vld [vmem:[%s118_s0] sm:$0x3]  ;;  %s66_s0 = smov 125   ;;  %s69_s12 = smov 116  }
   0x2   :  { %6 = vst [vmem:[#allocation0] sm:$0x3] %v5_v0  ;;  %s70_s13 = smov 113   ;;  %s71_s14 = smov 110  }
   0x3   :  { %s72_s15 = smov 107  }
   0x9   :  { %v10_v1 = vld [vmem:[#allocation0] sm:$0x3]  }
   0xa   :  { %v22_v2 = vld [vmem:[#allocation0] sm:$0x3]   ;;  %11 = vrot.lane.b32.xlu0 %v10_v1, %s66_s0 }
   0xb   :  { %23 = vrot.lane.b32.xlu1 %v22_v2, %s67_s8  ;;  %v16_v3 = vld [vmem:[#allocation0] sm:$0x3]  }
   0xc   :  { %v28_v4 = vld [vmem:[#allocation0] sm:$0x3]  }
   0xd   :  { %v7_v5 = vld [vmem:[#allocation0] sm:$0x3]  }
   0xe   :  { %9 = vst.msk [vmem:[%s119_s1] ss:$8 sm:$0x3] %vm8_vm0, %v7_v5   ;;  %17 = vrot.lane.b32.xlu0 %v16_v3, %s68_s11  ;;  %v34_v6 = vld [vmem:[#allocation0] sm:$0x3]  }
   0xf   :  { %29 = vrot.lane.b32.xlu1 %v28_v4, %s69_s12  ;;  %v40_v7 = vld [vmem:[#allocation0] sm:$0x3]  }
  0x10   :  { %v46_v8 = vld [vmem:[#allocation0] sm:$0x3]  }
  0x12   :  { %35 = vrot.lane.b32.xlu0 %v34_v6, %s70_s13 }
  0x13   :  { %41 = vrot.lane.b32.xlu1 %v40_v7, %s71_s14 }
  0x16   :  { %47 = vrot.lane.b32.xlu0 %v46_v8, %s72_s15 }
  0x7c   :  { %v12_v9 = vpop.permute.xlu0 %11  }
  0x7d   :  { %v24_v10 = vpop.permute.xlu1 %23   ;;  %52 = vst.msk [vmem:[%s119_s1 + $0x1] ss:$8 sm:$0x3] %vm8_vm0, %v12_v9  }
  0x7e   :  { %54 = vst.msk [vmem:[%s119_s1 + $0x3] ss:$8 sm:$0x3] %vm8_vm0, %v24_v10  }
  0x80   :  { %v18_v11 = vpop.permute.xlu0 %17  }
  0x81   :  { %v30_v12 = vpop.permute.xlu1 %29   ;;  %53 = vst.msk [vmem:[%s119_s1 + $0x2] ss:$8 sm:$0x3] %vm8_vm0, %v18_v11  }
  0x82   :  { %55 = vst.msk [vmem:[%s119_s1 + $0x4] ss:$8 sm:$0x3] %vm8_vm0, %v30_v12  }
  0x84   :  { %v36_v13 = vpop.permute.xlu0 %35  }
  0x85   :  { %v42_v14 = vpop.permute.xlu1 %41   ;;  %56 = vst.msk [vmem:[%s119_s1 + $0x5] ss:$8 sm:$0x3] %vm8_vm0, %v36_v13  }
  0x86   :  { %57 = vst.msk [vmem:[%s119_s1 + $0x6] ss:$8 sm:$0x3] %vm8_vm0, %v42_v14  }
  0x88   :  { %v48_v15 = vpop.permute.xlu0 %47  }
  0x89   :  { %58 = vst.msk [vmem:[%s119_s1 + $0x7] ss:$8 sm:$0x3] %vm8_vm0, %v48_v15  }

// kernel: main_model_forward.1
= control target key start
LH: loop header
LB: loop body
LE: loop exit
PB: predicated region body
PF: predicated region fallthrough
CT: control target
= control target key end

     0   :  { %s1320_s27 = smov 0   ;;  %s1499_s0 = inlined_call_operand.vmem [shape: bf16[2,256,36], index: 0, kind: input, shape index: {}]   ;;  %s1500_s1 = inlined_call_operand.vmem [shape: f32[2,1,128], index: 1, kind: input, shape index: {}]   ;;  %s1501_s2 = inlined_call_operand.vmem [shape: bf16[36,128], index: 2, kind: input, shape index: {}]   ;;  %s1502_s3 = inlined_call_operand.vmem [shape: f32[1,128], index: 3, kind: input, shape index: {}]   ;;  %s1503_s4 = inlined_call_operand.vmem [shape: bf16[128,128], index: 4, kind: input, shape index: {}]   ;;  %s1504_s5 = inlined_call_operand.vmem [shape: f32[1,128], index: 5, kind: input, shape index: {}]   ;;  %s1505_s6 = inlined_call_operand.vmem [shape: bf16[128,128], index: 6, kind: input, shape index: {}]   ;;  %s1506_s7 = inlined_call_operand.vmem [shape: f32[1,128], index: 7, kind: input, shape index: {}]   ;;  %s1507_s8 = inlined_call_operand.vmem [shape: f32[2,8,128], index: 8, kind: output, shape index: {}]  }
   0x1 LB: > { %s1038_s28 = sadd.s32 4294967295, %s1271_s27   ;;  %p1042_p0 = scmp.ge.s32.totalorder %s1271_s27, 1  ;;  %s1271_s27 = sphi %s1320_s27, %s18_s27  }
   0x2   : > { %p270_p1 = scmp.lt.s32.totalorder %s1271_s27, 3 }
   0x4   : > { %p271_p2 = pnand %p1042_p0, %p270_p1 }
   0x5   : > { %p306_p3 = scmp.lt.s32.totalorder (!%p271_p2), %s1038_s28, 1 }
   0x6   : > { %274 = sbr.rel (%p271_p2) target bundleno = 703 (0x2bf), region = 52 }
   0xb   : > { %v1230_v0 = vld [vmem:[%s1501_s2 + $0x10] ss:$0 sps:$4 sm:$0x33]   ;;  %vm507_vm0 = vcmask 1041408   ;;  %v1231_v1 = vld [vmem:[%s1501_s2 + $0x8] sm:$0xff]   ;;  %v1232_v3 = vld [vmem:[%s1501_s2] sm:$0xff]  }
   0xc   : > { %1219 = vmatprep.subr.msk.bf16.mxu0 %vm507_vm0, %v1230_v0  ;;  %v509_v2 = vsel %vm507_vm0, %v1230_v0, 0  ;;  %s1509_s28 = smov (!%p306_p3, %s1038_s28), 1  ;;  %vm458_vm1 = vcmask 293888   ;;  %v1249_v20 = vld [vmem:[%s1503_s4 + $0x38] sm:$0xff]   ;;  %v1273_v21 = vmov 0.0   ;;  %v1250_v22 = vld [vmem:[%s1503_s4 + $0x30] sm:$0xff]  }
   0xd   : > { %1142 = vmatpush3.bf16.msra.mxu0 %v509_v2  ;;  %s1103_s13 = sshll.u32 %s1509_s28, 7  ;;  %1179 = vmatprep.subr.bf16.mxu1 %v1273_v21  ;;  %v1251_v23 = vld [vmem:[%s1503_s4 + $0x28] sm:$0xff]   ;;  %v1252_v24 = vld [vmem:[%s1503_s4 + $0x20] sm:$0xff]   ;;  %v1253_v25 = vld [vmem:[%s1503_s4 + $0x18] sm:$0xff]   ;;  %vm1274_vm2 = vmmov 0   ;;  %s313_s15 = scalar_lea.vmem %s1500_s1, %s1509_s28 }
   0xe   : > { %1143 = vmatprep.subr.bf16.mxu0 %v1231_v1  ;;  %s1343_s16 = scalar_lea.vmem %s1499_s0, %s1103_s13  ;;  %1180 = vmatpush3.bf16.msra.mxu1 %v1249_v20  ;;  %v1254_v26 = vld [vmem:[%s1503_s4 + $0x10] sm:$0xff]   ;;  %v1255_v27 = vld [vmem:[%s1503_s4 + $0x8] sm:$0xff]   ;;  %v1256_v28 = vld [vmem:[%s1503_s4] sm:$0xff]   ;;  %s1045_s18 = sshll.u32 %s1509_s28, 3 }
   0xf   : > { %v1233_v4 = vld [vmem:[%s1343_s16] sm:$0xff]   ;;  %v1234_v5 = vld [vmem:[%s1343_s16 + $0x8] sm:$0xff]   ;;  %v1235_v6 = vld [vmem:[%s1343_s16 + $0x10] sm:$0xff]   ;;  %1181 = vmatprep.subr.bf16.mxu1 %v1273_v21  ;;  %1195 = vmatprep.mubr.msk.bf16.mxu1 %vm1274_vm2, %v1273_v21  ;;  %s317_s21 = scalar_lea.vmem %s1507_s8, %s1045_s18 }
  0x10   : > { %1147 = vmatprep.mubr.msk.bf16.mxu0 %vm458_vm1, %v1233_v4  ;;  %v1236_v7 = vld [vmem:[%s1343_s16 + $0x18] sm:$0xff]   ;;  %v1237_v8 = vld [vmem:[%s1343_s16 + $0x20] sm:$0xff]   ;;  %v1238_v9 = vld [vmem:[%s1343_s16 + $0x28] sm:$0xff]  }
  0x11   : > { %1144 = vmatpush3.bf16.msra.mxu0 %v1231_v1  ;;  %v1239_v10 = vld [vmem:[%s1343_s16 + $0x30] sm:$0xff]   ;;  %v1240_v11 = vld [vmem:[%s1343_s16 + $0x38] sm:$0xff]   ;;  %v1241_v12 = vld [vmem:[%s1343_s16 + $0x40] sm:$0xff]  }
  0x12   : > { %1145 = vmatprep.subr.bf16.mxu0 %v1232_v3  ;;  %v1242_v13 = vld [vmem:[%s1343_s16 + $0x48] sm:$0xff]   ;;  %v1243_v14 = vld [vmem:[%s1343_s16 + $0x50] sm:$0xff]   ;;  %v1244_v15 = vld [vmem:[%s1343_s16 + $0x58] sm:$0xff]   ;;  %1182 = vmatpush3.bf16.msra.mxu1 %v1250_v22 }
  0x13   : > { %v1245_v16 = vld [vmem:[%s1343_s16 + $0x60] sm:$0xff]   ;;  %v1246_v17 = vld [vmem:[%s1343_s16 + $0x68] sm:$0xff]   ;;  %v1247_v18 = vld [vmem:[%s1343_s16 + $0x70] sm:$0xff]   ;;  %1183 = vmatprep.subr.bf16.mxu1 %v1273_v21 }
  0x14   : > { %v1248_v19 = vld [vmem:[%s1343_s16 + $0x78] sm:$0xff]   ;;  %v1415_v31 = vld [vmem:[%s1502_s3] ss:$0 sm:$0xff] }
  0x15   : > { %1146 = vmatpush3.bf16.msra.mxu0 %v1232_v3 }
  0x16   : > { %1184 = vmatpush3.bf16.msra.mxu1 %v1251_v23 }
  0x17   : > { %1185 = vmatprep.subr.bf16.mxu1 %v1273_v21 }
  0x18   : > { %1148 = vmatmul.mubr.msk.bf16.vlgmr.msra.gmra.mxu0 %vm458_vm1, %v1234_v5 }
  0x19   : > { %1151 = vmatprep.mubr.msk.bf16.mxu0 %vm458_vm1, %v1235_v6 }
  0x1a   : > { %1186 = vmatpush3.bf16.msra.mxu1 %v1252_v24 }
  0x1b   : > { %1187 = vmatprep.subr.bf16.mxu1 %v1273_v21 }
  0x1e   : > { %1188 = vmatpush3.bf16.msra.mxu1 %v1253_v25 }
  0x1f   : > { %1189 = vmatprep.subr.bf16.mxu1 %v1273_v21 }
  0x20   : > { %1152 = vmatmul.mubr.msk.bf16.gmra.mxu0 %vm458_vm1, %v1236_v7 }
  0x21   : > { %1155 = vmatprep.mubr.msk.bf16.mxu0 %vm458_vm1, %v1237_v8 }
  0x22   : > { %1190 = vmatpush3.bf16.msra.mxu1 %v1254_v26 }
  0x23   : > { %1191 = vmatprep.subr.bf16.mxu1 %v1273_v21 }
  0x26   : > { %1192 = vmatpush3.bf16.msra.mxu1 %v1255_v27 }
  0x27   : > { %1193 = vmatprep.subr.bf16.mxu1 %v1273_v21 }
  0x28   : > { %1156 = vmatmul.mubr.msk.bf16.gmra.mxu0 %vm458_vm1, %v1238_v9 }
  0x29   : > { %1159 = vmatprep.mubr.msk.bf16.mxu0 %vm458_vm1, %v1239_v10 }
  0x2a   : > { %1194 = vmatpush3.bf16.msra.mxu1 %v1256_v28 }
  0x2b   : > { %1199 = vmatprep.subr.bf16.mxu1 %v1273_v21 }
  0x30   : > { %1160 = vmatmul.mubr.msk.bf16.gmra.mxu0 %vm458_vm1, %v1240_v11 }
  0x31   : > { %1163 = vmatprep.mubr.msk.bf16.mxu0 %vm458_vm1, %v1241_v12 }
  0x38   : > { %1164 = vmatmul.mubr.msk.bf16.gmra.mxu0 %vm458_vm1, %v1242_v13 }
  0x39   : > { %1167 = vmatprep.mubr.msk.bf16.mxu0 %vm458_vm1, %v1243_v14 }
  0x40   : > { %1168 = vmatmul.mubr.msk.bf16.gmra.mxu0 %vm458_vm1, %v1244_v15 }
  0x41   : > { %1171 = vmatprep.mubr.msk.bf16.mxu0 %vm458_vm1, %v1245_v16 }
  0x48   : > { %1172 = vmatmul.mubr.msk.bf16.gmra.mxu0 %vm458_vm1, %v1246_v17 }
  0x49   : > { %1175 = vmatprep.mubr.msk.bf16.mxu0 %vm458_vm1, %v1247_v18 }
  0x50   : > { %1176 = vmatmul.mubr.msk.bf16.gmra.mxu0 %vm458_vm1, %v1248_v19 }
  0xd8   : > { %v1149_v29 = vpop.f32.mrf.mxu0 }
  0xd9   : > { %v554_v35 = vadd.f32 %v1149_v29, %v1415_v31 }
  0xda   : > { %v545_v30 = vpop.f32.mrf.mxu0 }
  0xdb   : > { %v546_v33 = vadd.f32 %v1415_v31, %v545_v30  ;;  %v674_v42 = vmax.f32 %v554_v35, 0.0 }
  0xdc   : > { %v1150_v32 = vpop.f32.mrf.mxu0 }
  0xdd   : > { %v672_v38 = vmax.f32 %v546_v33, 0.0  ;;  %v557_v39 = vadd.f32 %v1150_v32, %v1415_v31 }
  0xde   : > { %v548_v34 = vpop.f32.mrf.mxu0 }
  0xdf   : > { %v549_v36 = vadd.f32 %v1415_v31, %v548_v34  ;;  %v675_v46 = vmax.f32 %v557_v39, 0.0 }
  0xe0   : > { %v1153_v37 = vpop.f32.mrf.mxu0 }
  0xe1   : > { %v673_v40 = vmax.f32 %v549_v36, 0.0  ;;  %v570_v49 = vadd.f32 %v1153_v37, %v1415_v31 }
  0xe2   : > { %v561_v41 = vpop.f32.mrf.mxu0 }
  0xe3   : > { %v704_v43 = vadd.f32 %v673_v40, %v672_v38  ;;  %v562_v44 = vadd.f32 %v1415_v31, %v561_v41  ;;  %v678_v58 = vmax.f32 %v570_v49, 0.0 }
  0xe4   : > { %v1154_v45 = vpop.f32.mrf.mxu0 }
  0xe5   : > { %v705_v47 = vadd.f32 %v704_v43, %v674_v42  ;;  %v676_v50 = vmax.f32 %v562_v44, 0.0  ;;  %v573_v55 = vadd.f32 %v1154_v45, %v1415_v31 }
  0xe6   : > { %v564_v48 = vpop.f32.mrf.mxu0 }
  0xe7   : > { %v706_v51 = vadd.f32 %v705_v47, %v675_v46  ;;  %v565_v52 = vadd.f32 %v1415_v31, %v564_v48  ;;  %v679_v62 = vmax.f32 %v573_v55, 0.0 }
  0xe8   : > { %v1157_v53 = vpop.f32.mrf.mxu0 }
  0xe9   : > { %v707_v54 = vadd.f32 %v706_v51, %v676_v50  ;;  %v677_v56 = vmax.f32 %v565_v52, 0.0  ;;  %v586_v1 = vadd.f32 %v1157_v53, %v1415_v31 }
  0xea   : > { %v577_v57 = vpop.f32.mrf.mxu0 }
  0xeb   : > { %v708_v59 = vadd.f32 %v707_v54, %v677_v56  ;;  %v578_v60 = vadd.f32 %v1415_v31, %v577_v57  ;;  %v682_v10 = vmax.f32 %v586_v1, 0.0 }
  0xec   : > { %v1158_v61 = vpop.f32.mrf.mxu0 }
  0xed   : > { %v709_v63 = vadd.f32 %v708_v59, %v678_v58  ;;  %v680_v2 = vmax.f32 %v578_v60, 0.0  ;;  %v589_v7 = vadd.f32 %v1158_v61, %v1415_v31 }
  0xee   : > { %v580_v0 = vpop.f32.mrf.mxu0 }
  0xef   : > { %v710_v3 = vadd.f32 %v709_v63, %v679_v62  ;;  %v581_v4 = vadd.f32 %v1415_v31, %v580_v0  ;;  %v683_v14 = vmax.f32 %v589_v7, 0.0 }
  0xf0   : > { %v1161_v5 = vpop.f32.mrf.mxu0 }
  0xf1   : > { %v711_v6 = vadd.f32 %v710_v3, %v680_v2  ;;  %v681_v8 = vmax.f32 %v581_v4, 0.0  ;;  %v602_v17 = vadd.f32 %v1161_v5, %v1415_v31 }
  0xf2   : > { %v593_v9 = vpop.f32.mrf.mxu0 }
  0xf3   : > { %v712_v11 = vadd.f32 %v711_v6, %v681_v8  ;;  %v594_v12 = vadd.f32 %v1415_v31, %v593_v9  ;;  %v686_v27 = vmax.f32 %v602_v17, 0.0 }
  0xf4   : > { %v1162_v13 = vpop.f32.mrf.mxu0 }
  0xf5   : > { %v713_v15 = vadd.f32 %v712_v11, %v682_v10  ;;  %v684_v18 = vmax.f32 %v594_v12, 0.0  ;;  %v605_v24 = vadd.f32 %v1162_v13, %v1415_v31 }
  0xf6   : > { %v596_v16 = vpop.f32.mrf.mxu0 }
  0xf7   : > { %v714_v19 = vadd.f32 %v713_v15, %v683_v14  ;;  %v597_v20 = vadd.f32 %v1415_v31, %v596_v16  ;;  %v687_v32 = vmax.f32 %v605_v24, 0.0 }
  0xf8   : > { %v1165_v22 = vpop.f32.mrf.mxu0 }
  0xf9   : > { %v715_v23 = vadd.f32 %v714_v19, %v684_v18  ;;  %v685_v25 = vmax.f32 %v597_v20, 0.0  ;;  %v618_v35 = vadd.f32 %v1165_v22, %v1415_v31 }
  0xfa   : > { %v609_v26 = vpop.f32.mrf.mxu0 }
  0xfb   : > { %v716_v28 = vadd.f32 %v715_v23, %v685_v25  ;;  %v610_v29 = vadd.f32 %v1415_v31, %v609_v26  ;;  %v690_v44 = vmax.f32 %v618_v35, 0.0 }
  0xfc   : > { %v1166_v30 = vpop.f32.mrf.mxu0 }
  0xfd   : > { %v717_v33 = vadd.f32 %v716_v28, %v686_v27  ;;  %v688_v36 = vmax.f32 %v610_v29, 0.0  ;;  %v621_v41 = vadd.f32 %v1166_v30, %v1415_v31 }
  0xfe   : > { %v612_v34 = vpop.f32.mrf.mxu0 }
  0xff   : > { %v718_v37 = vadd.f32 %v717_v33, %v687_v32  ;;  %v613_v38 = vadd.f32 %v1415_v31, %v612_v34  ;;  %v691_v48 = vmax.f32 %v621_v41, 0.0 }
 0x100   : > { %v1169_v39 = vpop.f32.mrf.mxu0 }
 0x101   : > { %v719_v40 = vadd.f32 %v718_v37, %v688_v36  ;;  %v689_v42 = vmax.f32 %v613_v38, 0.0  ;;  %v634_v51 = vadd.f32 %v1169_v39, %v1415_v31 }
 0x102   : > { %v625_v43 = vpop.f32.mrf.mxu0 }
 0x103   : > { %v720_v45 = vadd.f32 %v719_v40, %v689_v42  ;;  %v626_v46 = vadd.f32 %v1415_v31, %v625_v43  ;;  %v694_v60 = vmax.f32 %v634_v51, 0.0  ;;  %v1257_v40 = vld [vmem:[%s1505_s6 + $0x38] sm:$0xff]   ;;  %v1259_v42 = vld [vmem:[%s1505_s6 + $0x28] sm:$0xff]   ;;  %v1260_v43 = vld [vmem:[%s1505_s6 + $0x20] sm:$0xff]  }
 0x104   : > { %v1170_v47 = vpop.f32.mrf.mxu0 }
 0x105   : > { %v721_v49 = vadd.f32 %v720_v45, %v690_v44  ;;  %v692_v52 = vmax.f32 %v626_v46, 0.0  ;;  %v637_v57 = vadd.f32 %v1170_v47, %v1415_v31  ;;  %v1261_v44 = vld [vmem:[%s1505_s6 + $0x18] sm:$0xff]   ;;  %v1262_v45 = vld [vmem:[%s1505_s6 + $0x10] sm:$0xff]   ;;  %v1263_v46 = vld [vmem:[%s1505_s6 + $0x8] sm:$0xff]  }
 0x106   : > { %v628_v50 = vpop.f32.mrf.mxu0  ;;  %v1264_v47 = vld [vmem:[%s1505_s6] sm:$0xff]  }
 0x107   : > { %v722_v53 = vadd.f32 %v721_v49, %v691_v48  ;;  %v629_v54 = vadd.f32 %v1415_v31, %v628_v50  ;;  %v695_v0 = vmax.f32 %v637_v57, 0.0  ;;  %v1082_v48 = vld [vmem:[%s1504_s5] ss:$0 sm:$0xff] }
 0x108   : > { %v1173_v55 = vpop.f32.mrf.mxu0  ;;  %v1100_v57 = vld [vmem:[%s313_s15] ss:$0 sm:$0xff] }
 0x109   : > { %v723_v56 = vadd.f32 %v722_v53, %v692_v52  ;;  %v693_v58 = vmax.f32 %v629_v54, 0.0  ;;  %v650_v3 = vadd.f32 %v1173_v55, %v1415_v31 }
 0x10a   : > { %v641_v59 = vpop.f32.mrf.mxu0 }
 0x10b   : > { %v724_v61 = vadd.f32 %v723_v56, %v693_v58  ;;  %v642_v62 = vadd.f32 %v1415_v31, %v641_v59  ;;  %v698_v12 = vmax.f32 %v650_v3, 0.0 }
 0x10c   : > { %v1174_v63 = vpop.f32.mrf.mxu0 }
 0x10d   : > { %v725_v1 = vadd.f32 %v724_v61, %v694_v60  ;;  %v696_v4 = vmax.f32 %v642_v62, 0.0  ;;  %v653_v9 = vadd.f32 %v1174_v63, %v1415_v31 }
 0x10e   : > { %v644_v2 = vpop.f32.mrf.mxu0 }
 0x10f   : > { %v726_v5 = vadd.f32 %v725_v1, %v695_v0  ;;  %v645_v6 = vadd.f32 %v1415_v31, %v644_v2  ;;  %v699_v16 = vmax.f32 %v653_v9, 0.0 }
 0x110   : > { %v1177_v7 = vpop.f32.mrf.mxu0 }
 0x111   : > { %v727_v8 = vadd.f32 %v726_v5, %v696_v4  ;;  %v697_v10 = vmax.f32 %v645_v6, 0.0  ;;  %v666_v19 = vadd.f32 %v1177_v7, %v1415_v31 }
 0x112   : > { %v657_v11 = vpop.f32.mrf.mxu0 }
 0x113   : > { %v728_v13 = vadd.f32 %v727_v8, %v697_v10  ;;  %v658_v14 = vadd.f32 %v1415_v31, %v657_v11  ;;  %v702_v27 = vmax.f32 %v666_v19, 0.0 }
 0x114   : > { %v1178_v15 = vpop.f32.mrf.mxu0 }
 0x115   : > { %v729_v17 = vadd.f32 %v728_v13, %v698_v12  ;;  %v700_v20 = vmax.f32 %v658_v14, 0.0  ;;  %v669_v25 = vadd.f32 %v1178_v15, %v1415_v31 }
 0x116   : > { %v660_v18 = vpop.f32.mrf.mxu0 }
 0x117   : > { %v730_v22 = vadd.f32 %v729_v17, %v699_v16  ;;  %v661_v23 = vadd.f32 %v1415_v31, %v660_v18  ;;  %v703_v29 = vmax.f32 %v669_v25, 0.0  ;;  %v1258_v31 = vld [vmem:[%s1505_s6 + $0x30] sm:$0xff]  }
 0x119   : > { %v731_v24 = vadd.f32 %v730_v22, %v700_v20  ;;  %v701_v26 = vmax.f32 %v661_v23, 0.0 }
 0x11b   : > { %v732_v28 = vadd.f32 %v731_v24, %v701_v26 }
 0x11d   : > { %v733_v30 = vadd.f32 %v732_v28, %v702_v27 }
 0x11f   : > { %v734_v32 = vadd.f32 %v733_v30, %v703_v29 }
 0x121   : > { %v735_v33 = vrot.slane %v734_v32, 4 }
 0x123   : > { %v736_v34 = vadd.f32 %v735_v33, %v734_v32 }
 0x125   : > { %v737_v35 = vrot.slane %v736_v34, 2 }
 0x127   : > { %v738_v36 = vadd.f32 %v737_v35, %v736_v34 }
 0x129   : > { %v739_v37 = vrot.slane %v738_v36, 1 }
 0x12b   : > { %v740_v38 = vadd.f32 %v739_v37, %v738_v36 }
 0x12d   : > { %v741_v39 = vmul.f32 0.00390625, %v740_v38 }
 0x12f   : > { %v742_v41 = vpack.c.bf16 %v741_v39, %v741_v39 }
 0x131   : > { %1196 = vmatmul.mubr.bf16.vlgmr.msra.gmra.mxu1 %v742_v41 }
 0x132   : > { %1200 = vmatpush3.bf16.msra.mxu1 %v1257_v40  ;;  %1215 = vmatprep.mubr.msk.bf16.mxu1 %vm1274_vm2, %v1273_v21 }
 0x133   : > { %1201 = vmatprep.subr.bf16.mxu1 %v1273_v21 }
 0x136   : > { %1202 = vmatpush3.bf16.msra.mxu1 %v1258_v31 }
 0x137   : > { %1203 = vmatprep.subr.bf16.mxu1 %v1273_v21 }
 0x13a   : > { %1204 = vmatpush3.bf16.msra.mxu1 %v1259_v42 }
 0x13b   : > { %1205 = vmatprep.subr.bf16.mxu1 %v1273_v21 }
 0x13e   : > { %1206 = vmatpush3.bf16.msra.mxu1 %v1260_v43 }
 0x13f   : > { %1207 = vmatprep.subr.bf16.mxu1 %v1273_v21 }
 0x142   : > { %1208 = vmatpush3.bf16.msra.mxu1 %v1261_v44 }
 0x143   : > { %1209 = vmatprep.subr.bf16.mxu1 %v1273_v21 }
 0x146   : > { %1210 = vmatpush3.bf16.msra.mxu1 %v1262_v45 }
 0x147   : > { %1211 = vmatprep.subr.bf16.mxu1 %v1273_v21 }
 0x14a   : > { %1212 = vmatpush3.bf16.msra.mxu1 %v1263_v46 }
 0x14b   : > { %1213 = vmatprep.subr.bf16.mxu1 %v1273_v21  ;;  %v1091_v21 = vld [vmem:[%s1506_s7] ss:$0 sm:$0xff] }
 0x14e   : > { %1214 = vmatpush3.bf16.msra.mxu1 %v1264_v47 }
 0x1f1   : > { %v848_v49 = vpop.f32.mrf.mxu1 }
 0x1f2   : > { %v849_v50 = vadd.f32 %v1082_v48, %v848_v49 }
 0x1f3   : > { %v1197_v51 = vpop.f32.mrf.mxu1 }
 0x1f4   : > { %v854_v52 = vmax.f32 %v849_v50, 0.0 }
 0x1f5   : > { %v851_v53 = vpop.f32.mrf.mxu1 }
 0x1f6   : > { %v855_v54 = vpack.c.bf16 %v854_v52, %v854_v52 }
 0x1f7   : > { %v1198_v55 = vpop.f32.mrf.mxu1 }
 0x1f8   : > { %1216 = vmatmul.mubr.bf16.vlgmr.msra.gmra.mxu1 %v855_v54 }
 0x2b8   : > { %v961_v56 = vpop.f32.mrf.mxu1 }
 0x2b9   : > { %v962_v58 = vadd.f32 %v1091_v21, %v961_v56 }
 0x2ba   : > { %v1217_v59 = vpop.f32.mrf.mxu1 }
 0x2bb   : > { %v974_v60 = vadd.f32 %v1100_v57, %v962_v58 }
 0x2bc   : > { %v964_v61 = vpop.f32.mrf.mxu1 }
 0x2bd   : > { %975 = vst [vmem:[%s317_s21] sm:$0xff] %v974_v60 }
 0x2be   : > { %v1218_v62 = vpop.f32.mrf.mxu1 }
 0x2bf PF: > { %s18_s27 = sadd.s32 1, %s1271_s27  }
 0x2c0   : > { %p15_p4 = scmp.ge.s32.totalorder %s18_s27, 4  }
 0x2c2   :  { %17 = sbr.rel (!%p15_p4) target bundleno = 1 (0x1), region = 85 }

</bundles_post_ra>
